<compile_context>
chip_gen: v7x
topology: tpu7x:2x2x1
jax: 0.10.0
libtpu: 0.0.40
codegen_flags: <defaults>
</compile_context>

<pallas_src>
import jax
import jax.numpy as jnp
from jax.experimental import pallas as pl
from jax.experimental.pallas import tpu as pltpu


def _round_up(x, m):
    return (x + m - 1) // m * m


# -----------------------------------------------------------------------------
# Kernels
# -----------------------------------------------------------------------------
def _sac_critic_kernel_fused(obs_ref, act_ref,
                             w1o_ref, w1a_ref, b1_ref,
                             w2_ref, b2_ref,
                             w3_ref, b3_ref,
                             out_ref):
    """2H <= 128: block-diagonal layer-2, 4 MXU matmuls total."""
    cdt = w2_ref.dtype
    # Layer 1: x @ W1 == obs @ W1[:Do] + act @ W1[Do:]  (concat folded away).
    h = (jnp.dot(obs_ref[...], w1o_ref[...], preferred_element_type=jnp.float32)
         + jnp.dot(act_ref[...], w1a_ref[...], preferred_element_type=jnp.float32)
         + b1_ref[...])
    h = jnp.maximum(h, 0.0).astype(cdt)

    # Layer 2 (block-diagonal over the two heads, padded to 128 lanes).
    h = jnp.dot(h, w2_ref[...], preferred_element_type=jnp.float32) + b2_ref[...]
    h = jnp.maximum(h, 0.0).astype(cdt)

    # Layer 3: narrow output; col 0 = q1, col 1 = q2, remaining lanes zero.
    out_ref[...] = (jnp.dot(h, w3_ref[...], preferred_element_type=jnp.float32)
                    + b3_ref[...]).astype(out_ref.dtype)


def _sac_critic_kernel_split(obs_ref, act_ref,
                             w1o_ref, w1a_ref, b1_ref,
                             w2a_ref, w2b_ref, b2_ref,
                             w3_ref, b3_ref,
                             out_ref):
    """2H > 128: per-head layer-2 dots on static 128-aligned lane slices."""
    cdt = w2a_ref.dtype
    hp = w2a_ref.shape[0]          # per-head padded hidden width (multiple of 128)

    h = (jnp.dot(obs_ref[...], w1o_ref[...], preferred_element_type=jnp.float32)
         + jnp.dot(act_ref[...], w1a_ref[...], preferred_element_type=jnp.float32)
         + b1_ref[...])
    h = jnp.maximum(h, 0.0).astype(cdt)

    b2 = b2_ref[...]
    ha = jnp.dot(h[:, :hp], w2a_ref[...], preferred_element_type=jnp.float32) + b2[:, :hp]
    hb = jnp.dot(h[:, hp:], w2b_ref[...], preferred_element_type=jnp.float32) + b2[:, hp:]
    ha = jnp.maximum(ha, 0.0).astype(cdt)
    hb = jnp.maximum(hb, 0.0).astype(cdt)

    w3 = w3_ref[...]
    out_ref[...] = (jnp.dot(ha, w3[:hp], preferred_element_type=jnp.float32)
                    + jnp.dot(hb, w3[hp:], preferred_element_type=jnp.float32)
                    + b3_ref[...]).astype(out_ref.dtype)


# -----------------------------------------------------------------------------
# Parameter init (PyTorch-style, per head) and fused/padded packing
# -----------------------------------------------------------------------------
def init_sac_critic_params(key, obs_dim, action_shape, hidden_dim):
    """U(-1/sqrt(fan_in), 1/sqrt(fan_in)) init; weights in (in, out) layout,
    biases kept 2-D (1, out)."""
    d_in = obs_dim + action_shape

    def linear(key, fan_in, fan_out):
        kw, kb = jax.random.split(key)
        bound = 1.0 / jnp.sqrt(jnp.float32(fan_in))
        w = jax.random.uniform(kw, (fan_in, fan_out), jnp.float32, -bound, bound)
        b = jax.random.uniform(kb, (1, fan_out), jnp.float32, -bound, bound)
        return w, b

    keys = jax.random.split(key, 6)
    w1a, b1a = linear(keys[0], d_in, hidden_dim)        # Q1
    w2a, b2a = linear(keys[1], hidden_dim, hidden_dim)
    w3a, b3a = linear(keys[2], hidden_dim, 1)
    w1b, b1b = linear(keys[3], d_in, hidden_dim)        # Q2
    w2b, b2b = linear(keys[4], hidden_dim, hidden_dim)
    w3b, b3b = linear(keys[5], hidden_dim, 1)
    return (w1a, b1a, w2a, b2a, w3a, b3a,
            w1b, b1b, w2b, b2b, w3b, b3b)


def pack_sac_critic_params(params, obs_dim, action_shape, hidden_dim,
                           param_dtype=jnp.bfloat16, out_width=8):
    """Fuse the two heads, pad widths to 128-lane multiples, cast weights to
    `param_dtype` (biases stay f32 and are added after f32 accumulation).

    Returns a 7-tuple (fused layer-2, 2H <= 128) or an 8-tuple (split layer-2)."""
    (w1a, b1a, w2a, b2a, w3a, b3a,
     w1b, b1b, w2b, b2b, w3b, b3b) = params
    H = hidden_dim
    split_l2 = (2 * H > 128)

    if split_l2:
        Hp = _round_up(H, 128)       # per-head padded hidden width
        W = 2 * Hp                   # fused activation width
        off_b = Hp                   # lane offset of head B
    else:
        Hp = None
        W = 128                      # _round_up(2H, 128)
        off_b = H

    # Layer 1: head A in lanes [0:H], head B in lanes [off_b:off_b+H].
    w1 = jnp.zeros((obs_dim + action_shape, W), jnp.float32)
    w1 = w1.at[:, :H].set(w1a).at[:, off_b:off_b + H].set(w1b)
    w1_obs = w1[:obs_dim].astype(param_dtype)
    w1_act = w1[obs_dim:].astype(param_dtype)
    b1 = jnp.zeros((1, W), jnp.float32)
    b1 = b1.at[:, :H].set(b1a).at[:, off_b:off_b + H].set(b1b)

    # Layer 2.
    b2 = jnp.zeros((1, W), jnp.float32)
    b2 = b2.at[:, :H].set(b2a).at[:, off_b:off_b + H].set(b2b)
    if split_l2:
        w2a_p = jnp.zeros((Hp, Hp), jnp.float32).at[:H, :H].set(w2a).astype(param_dtype)
        w2b_p = jnp.zeros((Hp, Hp), jnp.float32).at[:H, :H].set(w2b).astype(param_dtype)
    else:
        w2 = jnp.zeros((W, W), jnp.float32)
        w2 = w2.at[:H, :H].set(w2a).at[H:2 * H, H:2 * H].set(w2b).astype(param_dtype)

    # Layer 3: narrow (W, out_width) output; col 0 <- head A, col 1 <- head B.
    w3 = jnp.zeros((W, out_width), jnp.float32)
    w3 = w3.at[:H, 0:1].set(w3a).at[off_b:off_b + H, 1:2].set(w3b).astype(param_dtype)
    b3 = jnp.zeros((1, out_width), jnp.float32)
    b3 = b3.at[0, 0].set(b3a[0, 0]).at[0, 1].set(b3b[0, 0])

    if split_l2:
        return (w1_obs, w1_act, b1, w2a_p, w2b_p, b2, w3, b3)
    return (w1_obs, w1_act, b1, w2, b2, w3, b3)


# -----------------------------------------------------------------------------
# Forward wrapper
# -----------------------------------------------------------------------------
def sac_critic_forward(obs, action, packed_params, *, block_b=512):
    split_l2 = (len(packed_params) == 8)
    kernel = _sac_critic_kernel_split if split_l2 else _sac_critic_kernel_fused

    param_dtype = packed_params[0].dtype      # w1_obs dtype
    hidden_w = packed_params[2].shape[1]      # fused activation width (b1)
    out_w = packed_params[-2].shape[1]        # w3 output width

    obs = obs.astype(param_dtype)
    action = action.astype(param_dtype)
    B, obs_dim = obs.shape
    act_dim = action.shape[1]

    # Batch tiling: big default tile (per-step overhead and small DMAs dominate
    # otherwise), but keep >= 2 grid steps when B allows so the "parallel" axis
    # shards across both v7x TensorCores. Tile stays sublane (8) aligned.
    Bp = _round_up(B, 8)
    if Bp >= 16:
        tb = max(8, min(block_b, _round_up((Bp + 1) // 2, 8)))
    else:
        tb = Bp
    Bp = _round_up(Bp, tb)
    if Bp != B:
        obs = jnp.pad(obs, ((0, Bp - B), (0, 0)))
        action = jnp.pad(action, ((0, Bp - B), (0, 0)))
    grid = (Bp // tb,)

    # VMEM budget: resident weights (+ slack for possible double-buffering),
    # double-buffered I/O tiles, and a few f32 activation temporaries.
    in_itemsize = jnp.dtype(param_dtype).itemsize
    weight_bytes = sum(int(p.size) * p.dtype.itemsize for p in packed_params)
    io_bytes = 2 * tb * (obs_dim + act_dim) * in_itemsize + 2 * tb * out_w * 4
    act_bytes = 6 * tb * hidden_w * 4
    vmem_estimate = 2 * weight_bytes + io_bytes + act_bytes
    vmem_limit = int(min(max(2 * vmem_estimate, 32 * 1024 * 1024),
                         64 * 1024 * 1024))   # safe on v5e/v6e (128 MiB) and v7x (64 MiB)

    def build_call(weight_mode):
        in_specs = [
            pl.BlockSpec((tb, obs_dim), lambda i: (i, 0)),
            pl.BlockSpec((tb, act_dim), lambda i: (i, 0)),
        ]
        # Weights/biases: fully resident (constant block index).
        in_specs += [pl.BlockSpec(p.shape, lambda i: (0, 0), pipeline_mode=weight_mode)
                     for p in packed_params]
        out_specs = pl.BlockSpec((tb, out_w), lambda i: (i, 0))
        return pl.pallas_call(
            kernel,
            out_shape=jax.ShapeDtypeStruct((Bp, out_w), jnp.float32),
            grid=grid,
            in_specs=in_specs,
            out_specs=out_specs,
            compiler_params=pltpu.CompilerParams(
                dimension_semantics=("parallel",),
                vmem_limit_bytes=vmem_limit),
        )

    try:
        # Single-buffer the resident weights (their index_map never changes).
        out = build_call(pl.Buffered(1))(obs, action, *packed_params)
    except Exception:
        # Fallback: default double-buffering if Buffered(1) is unsupported.
        out = build_call(None)(obs, action, *packed_params)

    q1 = out[:B, 0:1]
    q2 = out[:B, 1:2]
    return q1, q2


# -----------------------------------------------------------------------------
# Pure-JAX reference (unfused, per-head, f32) for correctness checking
# -----------------------------------------------------------------------------
def _reference_forward(obs, action, params):
    (w1a, b1a, w2a, b2a, w3a, b3a,
     w1b, b1b, w2b, b2b, w3b, b3b) = params
    x = jnp.concatenate([obs, action], axis=1).astype(jnp.float32)

    def mlp(w1, b1, w2, b2, w3, b3):
        h = jnp.maximum(x @ w1 + b1, 0.0)
        h = jnp.maximum(h @ w2 + b2, 0.0)
        return h @ w3 + b3

    return (mlp(w1a, b1a, w2a, b2a, w3a, b3a),
            mlp(w1b, b1b, w2b, b2b, w3b, b3b))


if __name__ == "__main__":
    def run_case(case_id, B, obs_dim, action_shape, hidden_dim, param_dtype, atol, rtol):
        k = jax.random.fold_in(jax.random.PRNGKey(0), case_id)
        k_obs, k_act, k_par = jax.random.split(k, 3)
        obs = jax.random.normal(k_obs, (B, obs_dim), jnp.float32)
        action = jax.random.normal(k_act, (B, action_shape), jnp.float32)

        params = init_sac_critic_params(k_par, obs_dim, action_shape, hidden_dim)
        packed = pack_sac_critic_params(params, obs_dim, action_shape, hidden_dim,
                                        param_dtype=param_dtype)

        q1, q2 = sac_critic_forward(obs, action, packed)
        q1 = jax.block_until_ready(q1)
        q2 = jax.block_until_ready(q2)

        r1, r2 = _reference_forward(obs, action, params)
        assert q1.shape == (B, 1) and q2.shape == (B, 1)
        assert jnp.allclose(q1, r1, atol=atol, rtol=rtol)
        assert jnp.allclose(q2, r2, atol=atol, rtol=rtol)

    # 1) Fused layer-2 path (2H <= 128), f32 params, tight tolerance.
    run_case(0, 8, 24, 8, 32, jnp.float32, 1e-4, 1e-4)
    # 2) Split layer-2 path (H = 128), f32 params -> validates the new packing exactly.
    run_case(1, 32, 24, 8, 128, jnp.float32, 1e-4, 1e-4)
    # 3) Default bf16 weights/activations (+f32 accumulation), ragged batch.
    run_case(2, 20, 24, 8, 128, jnp.bfloat16, 3e-2, 3e-2)

    print("KERNEL_OK")
</pallas_src>

<mosaic_0001>
module attributes {stable_mosaic.version = 11 : i64} {
  func.func @_sac_critic_kernel_fused(%arg0: i32, %arg1: memref<8x24xf32, #tpu.memory_space<vmem>>, %arg2: memref<8x8xf32, #tpu.memory_space<vmem>>, %arg3: memref<24x128xf32, #tpu.memory_space<vmem>>, %arg4: memref<8x128xf32, #tpu.memory_space<vmem>>, %arg5: memref<1x128xf32, #tpu.memory_space<vmem>>, %arg6: memref<128x128xf32, #tpu.memory_space<vmem>>, %arg7: memref<1x128xf32, #tpu.memory_space<vmem>>, %arg8: memref<128x8xf32, #tpu.memory_space<vmem>>, %arg9: memref<1x8xf32, #tpu.memory_space<vmem>>, %arg10: memref<8x8xf32, #tpu.memory_space<vmem>>) attributes {dimension_semantics = [#tpu.dimension_semantics<parallel>], iteration_bounds = array<i64: 1>, scalar_prefetch = 0 : i64, scratch_operands = 0 : i64, tpu.core_type = #tpu.core_type<tc>, window_params = [{transform_indices = @transform_0, window_bounds = array<i64: 8, 24>}, {transform_indices = @transform_1, window_bounds = array<i64: 8, 8>}, {pipeline_mode = #tpu.pipeline_mode<synchronous>, transform_indices = @transform_2, window_bounds = array<i64: 24, 128>}, {pipeline_mode = #tpu.pipeline_mode<synchronous>, transform_indices = @transform_3, window_bounds = array<i64: 8, 128>}, {pipeline_mode = #tpu.pipeline_mode<synchronous>, transform_indices = @transform_4, window_bounds = array<i64: 1, 128>}, {pipeline_mode = #tpu.pipeline_mode<synchronous>, transform_indices = @transform_5, window_bounds = array<i64: 128, 128>}, {pipeline_mode = #tpu.pipeline_mode<synchronous>, transform_indices = @transform_6, window_bounds = array<i64: 1, 128>}, {pipeline_mode = #tpu.pipeline_mode<synchronous>, transform_indices = @transform_7, window_bounds = array<i64: 128, 8>}, {pipeline_mode = #tpu.pipeline_mode<synchronous>, transform_indices = @transform_8, window_bounds = array<i64: 1, 8>}, {transform_indices = @transform_9, window_bounds = array<i64: 8, 8>}]} {
    %c0 = arith.constant 0 : index
    %c0_0 = arith.constant 0 : index
    %0 = vector.load %arg1[%c0, %c0_0] : memref<8x24xf32, #tpu.memory_space<vmem>>, vector<8x24xf32>
    %c0_1 = arith.constant 0 : index
    %c0_2 = arith.constant 0 : index
    %1 = vector.load %arg3[%c0_1, %c0_2] : memref<24x128xf32, #tpu.memory_space<vmem>>, vector<24x128xf32>
    %cst = arith.constant dense<0.000000e+00> : vector<8x128xf32>
    %2 = tpu.matmul %0, %1, %cst {dimension_numbers = #tpu.dot_dimension_numbers<[1], [0], [0], [1], [0, 0, 1, 1], [], []>} : vector<8x24xf32>, vector<24x128xf32>, vector<8x128xf32> -> vector<8x128xf32>
    %c0_3 = arith.constant 0 : index
    %c0_4 = arith.constant 0 : index
    %3 = vector.load %arg2[%c0_3, %c0_4] : memref<8x8xf32, #tpu.memory_space<vmem>>, vector<8x8xf32>
    %c0_5 = arith.constant 0 : index
    %c0_6 = arith.constant 0 : index
    %4 = vector.load %arg4[%c0_5, %c0_6] : memref<8x128xf32, #tpu.memory_space<vmem>>, vector<8x128xf32>
    %cst_7 = arith.constant dense<0.000000e+00> : vector<8x128xf32>
    %5 = tpu.matmul %3, %4, %cst_7 {dimension_numbers = #tpu.dot_dimension_numbers<[1], [0], [0], [1], [0, 0, 1, 1], [], []>} : vector<8x8xf32>, vector<8x128xf32>, vector<8x128xf32> -> vector<8x128xf32>
    %6 = arith.addf %2, %5 : vector<8x128xf32>
    %c0_8 = arith.constant 0 : index
    %c0_9 = arith.constant 0 : index
    %7 = vector.load %arg5[%c0_8, %c0_9] : memref<1x128xf32, #tpu.memory_space<vmem>>, vector<1x128xf32>
    %8 = vector.broadcast %7 : vector<1x128xf32> to vector<8x128xf32>
    %9 = arith.addf %6, %8 : vector<8x128xf32>
    %cst_10 = arith.constant 0.000000e+00 : f32
    %10 = vector.broadcast %cst_10 : f32 to vector<8x128xf32>
    %11 = arith.maximumf %9, %10 : vector<8x128xf32>
    %c0_11 = arith.constant 0 : index
    %c0_12 = arith.constant 0 : index
    %12 = vector.load %arg6[%c0_11, %c0_12] : memref<128x128xf32, #tpu.memory_space<vmem>>, vector<128x128xf32>
    %cst_13 = arith.constant dense<0.000000e+00> : vector<8x128xf32>
    %13 = tpu.matmul %11, %12, %cst_13 {dimension_numbers = #tpu.dot_dimension_numbers<[1], [0], [0], [1], [0, 0, 1, 1], [], []>} : vector<8x128xf32>, vector<128x128xf32>, vector<8x128xf32> -> vector<8x128xf32>
    %c0_14 = arith.constant 0 : index
    %c0_15 = arith.constant 0 : index
    %14 = vector.load %arg7[%c0_14, %c0_15] : memref<1x128xf32, #tpu.memory_space<vmem>>, vector<1x128xf32>
    %15 = vector.broadcast %14 : vector<1x128xf32> to vector<8x128xf32>
    %16 = arith.addf %13, %15 : vector<8x128xf32>
    %cst_16 = arith.constant 0.000000e+00 : f32
    %17 = vector.broadcast %cst_16 : f32 to vector<8x128xf32>
    %18 = arith.maximumf %16, %17 : vector<8x128xf32>
    %c0_17 = arith.constant 0 : index
    %c0_18 = arith.constant 0 : index
    %19 = vector.load %arg8[%c0_17, %c0_18] : memref<128x8xf32, #tpu.memory_space<vmem>>, vector<128x8xf32>
    %cst_19 = arith.constant dense<0.000000e+00> : vector<8x8xf32>
    %20 = tpu.matmul %18, %19, %cst_19 {dimension_numbers = #tpu.dot_dimension_numbers<[1], [0], [0], [1], [0, 0, 1, 1], [], []>} : vector<8x128xf32>, vector<128x8xf32>, vector<8x8xf32> -> vector<8x8xf32>
    %c0_20 = arith.constant 0 : index
    %c0_21 = arith.constant 0 : index
    %21 = vector.load %arg9[%c0_20, %c0_21] : memref<1x8xf32, #tpu.memory_space<vmem>>, vector<1x8xf32>
    %22 = vector.broadcast %21 : vector<1x8xf32> to vector<8x8xf32>
    %23 = arith.addf %20, %22 : vector<8x8xf32>
    %c0_22 = arith.constant 0 : index
    %c0_23 = arith.constant 0 : index
    %24 = vector.load %arg10[%c0_22, %c0_23] : memref<8x8xf32, #tpu.memory_space<vmem>>, vector<8x8xf32>
    tpu.vector_store %arg10[%c0_22, %c0_23], %23 {strides = array<i32>} : memref<8x8xf32, #tpu.memory_space<vmem>>, vector<8x8xf32>,
    return
  }
  func.func @transform_0(%arg0: i32) -> (i32, i32) {
    %c0_i32 = arith.constant 0 : i32
    %c0_i32_0 = arith.constant 0 : i32
    return %arg0, %c0_i32 : i32, i32
  }
  func.func @transform_1(%arg0: i32) -> (i32, i32) {
    %c0_i32 = arith.constant 0 : i32
    %c0_i32_0 = arith.constant 0 : i32
    return %arg0, %c0_i32 : i32, i32
  }
  func.func @transform_2(%arg0: i32) -> (i32, i32) {
    %c0_i32 = arith.constant 0 : i32
    %c0_i32_0 = arith.constant 0 : i32
    %c0_i32_1 = arith.constant 0 : i32
    return %c0_i32, %c0_i32_0 : i32, i32
  }
  func.func @transform_3(%arg0: i32) -> (i32, i32) {
    %c0_i32 = arith.constant 0 : i32
    %c0_i32_0 = arith.constant 0 : i32
    %c0_i32_1 = arith.constant 0 : i32
    return %c0_i32, %c0_i32_0 : i32, i32
  }
  func.func @transform_4(%arg0: i32) -> (i32, i32) {
    %c0_i32 = arith.constant 0 : i32
    %c0_i32_0 = arith.constant 0 : i32
    %c0_i32_1 = arith.constant 0 : i32
    return %c0_i32, %c0_i32_0 : i32, i32
  }
  func.func @transform_5(%arg0: i32) -> (i32, i32) {
    %c0_i32 = arith.constant 0 : i32
    %c0_i32_0 = arith.constant 0 : i32
    %c0_i32_1 = arith.constant 0 : i32
    return %c0_i32, %c0_i32_0 : i32, i32
  }
  func.func @transform_6(%arg0: i32) -> (i32, i32) {
    %c0_i32 = arith.constant 0 : i32
    %c0_i32_0 = arith.constant 0 : i32
    %c0_i32_1 = arith.constant 0 : i32
    return %c0_i32, %c0_i32_0 : i32, i32
  }
  func.func @transform_7(%arg0: i32) -> (i32, i32) {
    %c0_i32 = arith.constant 0 : i32
    %c0_i32_0 = arith.constant 0 : i32
    %c0_i32_1 = arith.constant 0 : i32
    return %c0_i32, %c0_i32_0 : i32, i32
  }
  func.func @transform_8(%arg0: i32) -> (i32, i32) {
    %c0_i32 = arith.constant 0 : i32
    %c0_i32_0 = arith.constant 0 : i32
    %c0_i32_1 = arith.constant 0 : i32
    return %c0_i32, %c0_i32_0 : i32, i32
  }
  func.func @transform_9(%arg0: i32) -> (i32, i32) {
    %c0_i32 = arith.constant 0 : i32
    %c0_i32_0 = arith.constant 0 : i32
    return %arg0, %c0_i32 : i32, i32
  }
}

module attributes {stable_mosaic.version = 11 : i64} {
  func.func @_sac_critic_kernel_fused(%arg0: i32, %arg1: memref<8x24xf32, #tpu.memory_space<vmem>>, %arg2: memref<8x8xf32, #tpu.memory_space<vmem>>, %arg3: memref<24x128xf32, #tpu.memory_space<vmem>>, %arg4: memref<8x128xf32, #tpu.memory_space<vmem>>, %arg5: memref<1x128xf32, #tpu.memory_space<vmem>>, %arg6: memref<128x128xf32, #tpu.memory_space<vmem>>, %arg7: memref<1x128xf32, #tpu.memory_space<vmem>>, %arg8: memref<128x8xf32, #tpu.memory_space<vmem>>, %arg9: memref<1x8xf32, #tpu.memory_space<vmem>>, %arg10: memref<8x8xf32, #tpu.memory_space<vmem>>) attributes {dimension_semantics = [#tpu.dimension_semantics<parallel>], iteration_bounds = array<i64: 1>, scalar_prefetch = 0 : i64, scratch_operands = 0 : i64, tpu.core_type = #tpu.core_type<tc>, window_params = [{transform_indices = @transform_0, window_bounds = array<i64: 8, 24>}, {transform_indices = @transform_1, window_bounds = array<i64: 8, 8>}, {pipeline_mode = #tpu.pipeline_mode<synchronous>, transform_indices = @transform_2, window_bounds = array<i64: 24, 128>}, {pipeline_mode = #tpu.pipeline_mode<synchronous>, transform_indices = @transform_3, window_bounds = array<i64: 8, 128>}, {pipeline_mode = #tpu.pipeline_mode<synchronous>, transform_indices = @transform_4, window_bounds = array<i64: 1, 128>}, {pipeline_mode = #tpu.pipeline_mode<synchronous>, transform_indices = @transform_5, window_bounds = array<i64: 128, 128>}, {pipeline_mode = #tpu.pipeline_mode<synchronous>, transform_indices = @transform_6, window_bounds = array<i64: 1, 128>}, {pipeline_mode = #tpu.pipeline_mode<synchronous>, transform_indices = @transform_7, window_bounds = array<i64: 128, 8>}, {pipeline_mode = #tpu.pipeline_mode<synchronous>, transform_indices = @transform_8, window_bounds = array<i64: 1, 8>}, {transform_indices = @transform_9, window_bounds = array<i64: 8, 8>}]} {
    %c0 = arith.constant 0 : index
    %c0_0 = arith.constant 0 : index
    %0 = vector.load %arg1[%c0, %c0_0] : memref<8x24xf32, #tpu.memory_space<vmem>>, vector<8x24xf32>
    %c0_1 = arith.constant 0 : index
    %c0_2 = arith.constant 0 : index
    %1 = vector.load %arg3[%c0_1, %c0_2] : memref<24x128xf32, #tpu.memory_space<vmem>>, vector<24x128xf32>
    %cst = arith.constant dense<0.000000e+00> : vector<8x128xf32>
    %2 = tpu.matmul %0, %1, %cst {dimension_numbers = #tpu.dot_dimension_numbers<[1], [0], [0], [1], [0, 0, 1, 1], [], []>} : vector<8x24xf32>, vector<24x128xf32>, vector<8x128xf32> -> vector<8x128xf32>
    %c0_3 = arith.constant 0 : index
    %c0_4 = arith.constant 0 : index
    %3 = vector.load %arg2[%c0_3, %c0_4] : memref<8x8xf32, #tpu.memory_space<vmem>>, vector<8x8xf32>
    %c0_5 = arith.constant 0 : index
    %c0_6 = arith.constant 0 : index
    %4 = vector.load %arg4[%c0_5, %c0_6] : memref<8x128xf32, #tpu.memory_space<vmem>>, vector<8x128xf32>
    %cst_7 = arith.constant dense<0.000000e+00> : vector<8x128xf32>
    %5 = tpu.matmul %3, %4, %cst_7 {dimension_numbers = #tpu.dot_dimension_numbers<[1], [0], [0], [1], [0, 0, 1, 1], [], []>} : vector<8x8xf32>, vector<8x128xf32>, vector<8x128xf32> -> vector<8x128xf32>
    %6 = arith.addf %2, %5 : vector<8x128xf32>
    %c0_8 = arith.constant 0 : index
    %c0_9 = arith.constant 0 : index
    %7 = vector.load %arg5[%c0_8, %c0_9] : memref<1x128xf32, #tpu.memory_space<vmem>>, vector<1x128xf32>
    %8 = vector.broadcast %7 : vector<1x128xf32> to vector<8x128xf32>
    %9 = arith.addf %6, %8 : vector<8x128xf32>
    %cst_10 = arith.constant 0.000000e+00 : f32
    %10 = vector.broadcast %cst_10 : f32 to vector<8x128xf32>
    %11 = arith.maximumf %9, %10 : vector<8x128xf32>
    %c0_11 = arith.constant 0 : index
    %c0_12 = arith.constant 0 : index
    %12 = vector.load %arg6[%c0_11, %c0_12] : memref<128x128xf32, #tpu.memory_space<vmem>>, vector<128x128xf32>
    %cst_13 = arith.constant dense<0.000000e+00> : vector<8x128xf32>
    %13 = tpu.matmul %11, %12, %cst_13 {dimension_numbers = #tpu.dot_dimension_numbers<[1], [0], [0], [1], [0, 0, 1, 1], [], []>} : vector<8x128xf32>, vector<128x128xf32>, vector<8x128xf32> -> vector<8x128xf32>
    %c0_14 = arith.constant 0 : index
    %c0_15 = arith.constant 0 : index
    %14 = vector.load %arg7[%c0_14, %c0_15] : memref<1x128xf32, #tpu.memory_space<vmem>>, vector<1x128xf32>
    %15 = vector.broadcast %14 : vector<1x128xf32> to vector<8x128xf32>
    %16 = arith.addf %13, %15 : vector<8x128xf32>
    %cst_16 = arith.constant 0.000000e+00 : f32
    %17 = vector.broadcast %cst_16 : f32 to vector<8x128xf32>
    %18 = arith.maximumf %16, %17 : vector<8x128xf32>
    %c0_17 = arith.constant 0 : index
    %c0_18 = arith.constant 0 : index
    %19 = vector.load %arg8[%c0_17, %c0_18] : memref<128x8xf32, #tpu.memory_space<vmem>>, vector<128x8xf32>
    %cst_19 = arith.constant dense<0.000000e+00> : vector<8x8xf32>
    %20 = tpu.matmul %18, %19, %cst_19 {dimension_numbers = #tpu.dot_dimension_numbers<[1], [0], [0], [1], [0, 0, 1, 1], [], []>} : vector<8x128xf32>, vector<128x8xf32>, vector<8x8xf32> -> vector<8x8xf32>
    %c0_20 = arith.constant 0 : index
    %c0_21 = arith.constant 0 : index
    %21 = vector.load %arg9[%c0_20, %c0_21] : memref<1x8xf32, #tpu.memory_space<vmem>>, vector<1x8xf32>
    %22 = vector.broadcast %21 : vector<1x8xf32> to vector<8x8xf32>
    %23 = arith.addf %20, %22 : vector<8x8xf32>
    %c0_22 = arith.constant 0 : index
    %c0_23 = arith.constant 0 : index
    %24 = vector.load %arg10[%c0_22, %c0_23] : memref<8x8xf32, #tpu.memory_space<vmem>>, vector<8x8xf32>
    tpu.vector_store %arg10[%c0_22, %c0_23], %23 {strides = array<i32>} : memref<8x8xf32, #tpu.memory_space<vmem>>, vector<8x8xf32>,
    return
  }
  func.func @transform_0(%arg0: i32) -> (i32, i32) {
    %c0_i32 = arith.constant 0 : i32
    %c0_i32_0 = arith.constant 0 : i32
    return %arg0, %c0_i32 : i32, i32
  }
  func.func @transform_1(%arg0: i32) -> (i32, i32) {
    %c0_i32 = arith.constant 0 : i32
    %c0_i32_0 = arith.constant 0 : i32
    return %arg0, %c0_i32 : i32, i32
  }
  func.func @transform_2(%arg0: i32) -> (i32, i32) {
    %c0_i32 = arith.constant 0 : i32
    %c0_i32_0 = arith.constant 0 : i32
    %c0_i32_1 = arith.constant 0 : i32
    return %c0_i32, %c0_i32_0 : i32, i32
  }
  func.func @transform_3(%arg0: i32) -> (i32, i32) {
    %c0_i32 = arith.constant 0 : i32
    %c0_i32_0 = arith.constant 0 : i32
    %c0_i32_1 = arith.constant 0 : i32
    return %c0_i32, %c0_i32_0 : i32, i32
  }
  func.func @transform_4(%arg0: i32) -> (i32, i32) {
    %c0_i32 = arith.constant 0 : i32
    %c0_i32_0 = arith.constant 0 : i32
    %c0_i32_1 = arith.constant 0 : i32
    return %c0_i32, %c0_i32_0 : i32, i32
  }
  func.func @transform_5(%arg0: i32) -> (i32, i32) {
    %c0_i32 = arith.constant 0 : i32
    %c0_i32_0 = arith.constant 0 : i32
    %c0_i32_1 = arith.constant 0 : i32
    return %c0_i32, %c0_i32_0 : i32, i32
  }
  func.func @transform_6(%arg0: i32) -> (i32, i32) {
    %c0_i32 = arith.constant 0 : i32
    %c0_i32_0 = arith.constant 0 : i32
    %c0_i32_1 = arith.constant 0 : i32
    return %c0_i32, %c0_i32_0 : i32, i32
  }
  func.func @transform_7(%arg0: i32) -> (i32, i32) {
    %c0_i32 = arith.constant 0 : i32
    %c0_i32_0 = arith.constant 0 : i32
    %c0_i32_1 = arith.constant 0 : i32
    return %c0_i32, %c0_i32_0 : i32, i32
  }
  func.func @transform_8(%arg0: i32) -> (i32, i32) {
    %c0_i32 = arith.constant 0 : i32
    %c0_i32_0 = arith.constant 0 : i32
    %c0_i32_1 = arith.constant 0 : i32
    return %c0_i32, %c0_i32_0 : i32, i32
  }
  func.func @transform_9(%arg0: i32) -> (i32, i32) {
    %c0_i32 = arith.constant 0 : i32
    %c0_i32_0 = arith.constant 0 : i32
    return %arg0, %c0_i32 : i32, i32
  }
}

</mosaic_0001>

<bundles_post_ra>
// kernel: tpu_custom_call.1
= control target key start
LH: loop header
LB: loop body
LE: loop exit
PB: predicated region body
PF: predicated region fallthrough
CT: control target
= control target key end

     0   :  { %14 = vsyncpa [#allocation3], 0  ;;  %s958_s0 = inlined_call_operand.hbm [shape: f32[8,24], index: 0, kind: input, shape index: {}]   ;;  %s959_s1 = inlined_call_operand.hbm [shape: f32[8,8], index: 1, kind: input, shape index: {}]   ;;  %s960_s2 = inlined_call_operand.vmem [shape: f32[24,128], index: 2, kind: input, shape index: {}]   ;;  %s961_s3 = inlined_call_operand.hbm [shape: f32[8,128], index: 3, kind: input, shape index: {}]   ;;  %s962_s4 = inlined_call_operand.vmem [shape: f32[1,128], index: 4, kind: input, shape index: {}]   ;;  %s963_s5 = inlined_call_operand.vmem [shape: f32[128,128], index: 5, kind: input, shape index: {}]   ;;  %s964_s6 = inlined_call_operand.vmem [shape: f32[1,128], index: 6, kind: input, shape index: {}]   ;;  %s965_s7 = inlined_call_operand.vmem [shape: f32[128,8], index: 7, kind: input, shape index: {}]   ;;  %s966_s8 = inlined_call_operand.vmem [shape: f32[1,8], index: 8, kind: input, shape index: {}]   ;;  %s967_s9 = inlined_call_operand.hbm [shape: f32[8,8], index: 9, kind: output, shape index: {}]  }
   0x1   :  { %15 = vsyncpa [#allocation6], 0 }
   0x2   :  { %16 = vsyncpa [#allocation4], 0  ;;  %s716_s30 = smov [#allocation5]   ;;  %s717_s11 = smov [#allocation2]  }
   0x3   :  { %s33_s10 = sshll.u32 %s716_s30, 4  ;;  %s23_s12 = sshll.u32 %s717_s11, 4  ;;  %s34_s10 = int_to_ptr.vmem [resolvable:$true] %s33_s10  ;;  %s24_s12 = int_to_ptr.vmem [resolvable:$true] %s23_s12 }
   0x4   :  { %s622_s15 = scalar_lea.hbm %s959_s1, 128 }
   0x5   :  { %p623_p0 = scmp.ne.s32.totalorder %s959_s1, %s622_s15  ;;  %p626_p1 = scmp.lt.u32.totalorder %s622_s15, %s959_s1 }
   0x7   :  { %p628_p2 = pnand %p626_p1, %p623_p0 }
   0x9   :  { %631 = shalt.err (!%p628_p2)
}
   0xa   :  { %s632_s20 = scalar_lea.vmem %s34_s10, 128  ;;  %p637_p4 = scmp.lt.s32.totalorder %s34_s10, %s34_s10 }
   0xb   :  { %p633_p3 = scmp.ne.s32.totalorder %s34_s10, %s632_s20  ;;  %p638_p5 = scmp.lt.s32.totalorder %s632_s20, %s632_s20 }
   0xd   :  { %p639_p6 = por %p638_p5, %p637_p4 }
   0xf   :  { %p640_p7 = pnand %p639_p6, %p633_p3 }
  0x11   :  { %643 = shalt.err (!%p640_p7)
}
  0x12   :  { %36 = dma.hbm_to_vmem [thread:$0]  %s959_s1, 128, %s34_s10, [#allocation6]  }
  0x13   :  { %s644_s25 = scalar_lea.hbm %s958_s0, 128 }
  0x14   :  { %p645_p8 = scmp.ne.s32.totalorder %s958_s0, %s644_s25  ;;  %p648_p9 = scmp.lt.u32.totalorder %s644_s25, %s958_s0 }
  0x16   :  { %p650_p10 = pnand %p648_p9, %p645_p8 }
  0x18   :  { %653 = shalt.err (!%p650_p10)
}
  0x19   :  { %s654_s30 = scalar_lea.vmem %s24_s12, 128  ;;  %p659_p12 = scmp.lt.s32.totalorder %s24_s12, %s24_s12 }
  0x1a   :  { %p655_p11 = scmp.ne.s32.totalorder %s24_s12, %s654_s30  ;;  %p660_p13 = scmp.lt.s32.totalorder %s654_s30, %s654_s30 }
  0x1c   :  { %p661_p0 = por %p660_p13, %p659_p12 }
  0x1e   :  { %p662_p1 = pnand %p661_p0, %p655_p11 }
  0x20   :  { %665 = shalt.err (!%p662_p1)
}
  0x21   :  { %26 = dma.hbm_to_vmem [thread:$0]  %s958_s0, 128, %s24_s12, [#allocation3]  }
  0x22   :  { %s718_s11 = smov [#allocation7]   ;;  %s666_s16 = scalar_lea.hbm %s961_s3, 128 }
  0x23   :  { %s45_s13 = sshll.u32 %s718_s11, 4  ;;  %p667_p2 = scmp.ne.s32.totalorder %s961_s3, %s666_s16  ;;  %s46_s13 = int_to_ptr.vmem [resolvable:$true] %s45_s13 }
  0x24   :  { %p670_p3 = scmp.lt.u32.totalorder %s666_s16, %s961_s3 }
  0x26   :  { %p672_p4 = pnand %p670_p3, %p667_p2 }
  0x28   :  { %675 = shalt.err (!%p672_p4)
}
  0x29   :  { %s676_s21 = scalar_lea.vmem %s46_s13, 128  ;;  %p681_p6 = scmp.lt.s32.totalorder %s46_s13, %s46_s13 }
  0x2a   :  { %p677_p5 = scmp.ne.s32.totalorder %s46_s13, %s676_s21  ;;  %p682_p7 = scmp.lt.s32.totalorder %s676_s21, %s676_s21 }
  0x2c   :  { %p683_p8 = por %p682_p7, %p681_p6 }
  0x2e   :  { %p684_p9 = pnand %p683_p8, %p677_p5 }
  0x30   :  { %687 = shalt.err (!%p684_p9)
}
  0x31   :  { %48 = dma.hbm_to_vmem [thread:$0]  %s961_s3, 128, %s46_s13, [#allocation6]  }
  0x32   :  { %710 = dma.done.wait [#allocation3], 128  }
  0x33   :  { %711 = vsyncadd [#allocation3], 4294967168 }
  0x34   :  { %712 = dma.done.wait [#allocation6], 256  }
  0x35   :  { %713 = vsyncadd [#allocation6], 4294967040  ;;  %v719_v0 = vmov 0.0|0.0   ;;  %v720_v1 = vmov 0.0   ;;  %vm721_vm0 = vmmov 0   ;;  %vm74_vm1 = vcmask 64512  }
  0x36   :  { %564 = vmatprep.subr.bf16.mxu1 %v719_v0  ;;  %480 = vmatprep.subr.mxu0 %v720_v1  ;;  %v69_v2 = vld [vmem:[%s960_s2] sm:$0xff]  ;;  %v70_v3 = vld [vmem:[%s960_s2 + $0x8] sm:$0xff]  ;;  %v73_v4 = vld [vmem:[#allocation7] sm:$0xff]  ;;  %vm148_vm2 = vcmask 195584   ;;  %s722_s0 = smov [#allocation8]  }
  0x37   :  { %482 = vmatprep.mubr.msk.f32.mxu0 %vm721_vm0, %v720_v1  ;;  %491 = vmatprep.mubr.msk.f32.mxu1 %vm721_vm0, %v720_v1  ;;  %v565_v5 = vpack.c.bf16 %v70_v3, %v69_v2  ;;  %v72_v6 = vld [vmem:[#allocation5] sm:$0xff]  ;;  %v231_v7 = vld [vmem:[%s963_s5] sm:$0xff]  ;;  %v233_v9 = vld [vmem:[%s963_s5 + $0x10] sm:$0xff]  ;;  %s425_s12 = sshll.u32 %s722_s0, 4  ;;  %s426_s12 = int_to_ptr.vmem [resolvable:$true] %s425_s12 }
  0x38   :  { %481 = vmatpush3.msra.mxu0 %v73_v4  ;;  %v232_v8 = vld [vmem:[%s963_s5 + $0x8] sm:$0xff]  ;;  %v234_v11 = vld [vmem:[%s963_s5 + $0x18] sm:$0xff]  ;;  %v71_v12 = vld [vmem:[%s960_s2 + $0x10] sm:$0xff]  ;;  %p693_p11 = scmp.lt.s32.totalorder %s426_s12, %s426_s12 }
  0x39   :  { %483 = vmatmul.mubr.msk.f32.vlgmr.msra.gmra.mrb[0].mxu0 %vm74_vm1, %v72_v6  ;;  %567 = vmatprep.subr.bf16.mxu0 %v719_v0  ;;  %v568_v10 = vpack.c.bf16 %v232_v8, %v231_v7  ;;  %v68_v13 = vld [vmem:[#allocation2] sm:$0xff]  ;;  %v571_v14 = vpack.c.bf16 %v234_v11, %v233_v9  ;;  %v236_v16 = vld [vmem:[%s963_s5 + $0x28] sm:$0xff]  ;;  %v237_v18 = vld [vmem:[%s963_s5 + $0x30] sm:$0xff] }
  0x3a   :  { %566 = vmatpush3.bf16.msra.mxu1 %v565_v5  ;;  %526 = vmatprep.mubr.msk.f32.mxu0 %vm721_vm0, %v720_v1  ;;  %v235_v15 = vld [vmem:[%s963_s5 + $0x20] sm:$0xff]  ;;  %v238_v19 = vld [vmem:[%s963_s5 + $0x38] sm:$0xff]  ;;  %v240_v22 = vld [vmem:[%s963_s5 + $0x48] sm:$0xff] }
  0x3b   :  { %489 = vmatprep.subr.mxu1 %v720_v1  ;;  %569 = vmatpush3.bf16.msra.mxu0 %v568_v10  ;;  %v574_v17 = vpack.c.bf16 %v236_v16, %v235_v15  ;;  %v577_v20 = vpack.c.bf16 %v238_v19, %v237_v18  ;;  %v239_v21 = vld [vmem:[%s963_s5 + $0x40] sm:$0xff]  ;;  %v241_v24 = vld [vmem:[%s963_s5 + $0x50] sm:$0xff]  ;;  %v242_v25 = vld [vmem:[%s963_s5 + $0x58] sm:$0xff] }
  0x3c   :  { %570 = vmatprep.subr.bf16.mxu0 %v719_v0  ;;  %v580_v23 = vpack.c.bf16 %v240_v22, %v239_v21  ;;  %v583_v26 = vpack.c.bf16 %v242_v25, %v241_v24  ;;  %v243_v27 = vld [vmem:[%s963_s5 + $0x60] sm:$0xff]  ;;  %v244_v28 = vld [vmem:[%s963_s5 + $0x68] sm:$0xff]  ;;  %v245_v30 = vld [vmem:[%s963_s5 + $0x70] sm:$0xff] }
  0x3d   :  { %v586_v29 = vpack.c.bf16 %v244_v28, %v243_v27  ;;  %v246_v31 = vld [vmem:[%s963_s5 + $0x78] sm:$0xff]  ;;  %v325_v33 = vld [vmem:[%s965_s7] sm:$0xff]  ;;  %v326_v34 = vld [vmem:[%s965_s7 + $0x8] sm:$0xff] }
  0x3e   :  { %490 = vmatpush3.msra.mxu1 %v71_v12  ;;  %v589_v32 = vpack.c.bf16 %v246_v31, %v245_v30  ;;  %v327_v35 = vld [vmem:[%s965_s7 + $0x10] sm:$0xff]  ;;  %v592_v36 = vpack.c.bf16 %v326_v34, %v325_v33  ;;  %v328_v37 = vld [vmem:[%s965_s7 + $0x18] sm:$0xff]  ;;  %v329_v39 = vld [vmem:[%s965_s7 + $0x20] sm:$0xff] }
  0x3f   :  { %492 = vmatmul.mubr.msk.f32.vlgmr.msra.gmra.mrb[0].mxu1 %vm148_vm2, %v68_v13  ;;  %591 = vmatprep.subr.bf16.mxu1 %v719_v0  ;;  %v595_v38 = vpack.c.bf16 %v328_v37, %v327_v35  ;;  %v330_v40 = vld [vmem:[%s965_s7 + $0x28] sm:$0xff]  ;;  %v331_v42 = vld [vmem:[%s965_s7 + $0x30] sm:$0xff]  ;;  %v332_v43 = vld [vmem:[%s965_s7 + $0x38] sm:$0xff] }
  0x40   :  { %572 = vmatpush3.bf16.msra.mxu0 %v571_v14  ;;  %561 = vmatprep.mubr.msk.f32.mxu1 %vm721_vm0, %v720_v1  ;;  %v598_v41 = vpack.c.bf16 %v330_v40, %v329_v39  ;;  %v601_v44 = vpack.c.bf16 %v332_v43, %v331_v42  ;;  %v333_v45 = vld [vmem:[%s965_s7 + $0x40] sm:$0xff]  ;;  %v334_v46 = vld [vmem:[%s965_s7 + $0x48] sm:$0xff]  ;;  %v335_v48 = vld [vmem:[%s965_s7 + $0x50] sm:$0xff] }
  0x41   :  { %573 = vmatprep.subr.bf16.mxu0 %v719_v0  ;;  %593 = vmatpush3.bf16.msra.mxu1 %v592_v36  ;;  %v604_v47 = vpack.c.bf16 %v334_v46, %v333_v45  ;;  %v336_v49 = vld [vmem:[%s965_s7 + $0x58] sm:$0xff]  ;;  %v337_v51 = vld [vmem:[%s965_s7 + $0x60] sm:$0xff]  ;;  %v338_v52 = vld [vmem:[%s965_s7 + $0x68] sm:$0xff] }
  0x42   :  { %594 = vmatprep.subr.bf16.mxu1 %v719_v0  ;;  %v607_v50 = vpack.c.bf16 %v336_v49, %v335_v48  ;;  %v610_v53 = vpack.c.bf16 %v338_v52, %v337_v51  ;;  %v437_v57 = vld [vmem:[%s962_s4] ss:$0 sm:$0xff]  ;;  %v339_v62 = vld [vmem:[%s965_s7 + $0x70] sm:$0xff]  ;;  %v340_v63 = vld [vmem:[%s965_s7 + $0x78] sm:$0xff]  ;;  %s688_s7 = scalar_lea.vmem %s426_s12, 128 }
  0x43   :  { %v438_v1 = vld [vmem:[%s964_s6] ss:$0 sm:$0xff]  ;;  %p689_p10 = scmp.ne.s32.totalorder %s426_s12, %s688_s7  ;;  %p694_p12 = scmp.lt.s32.totalorder %s688_s7, %s688_s7 }
  0x44   :  { %575 = vmatpush3.bf16.msra.mxu0 %v574_v17  ;;  %v439_v6 = vld [vmem:[%s966_s8] ss:$0 sm:$0xff] }
  0x45   :  { %576 = vmatprep.subr.bf16.mxu0 %v719_v0  ;;  %596 = vmatpush3.bf16.msra.mxu1 %v595_v38  ;;  %p695_p13 = por %p694_p12, %p693_p11 }
  0x46   :  { %597 = vmatprep.subr.bf16.mxu1 %v719_v0 }
  0x47   :  { %p696_p0 = pnand %p695_p13, %p689_p10 }
  0x48   :  { %578 = vmatpush3.bf16.msra.mxu0 %v577_v20 }
  0x49   :  { %579 = vmatprep.subr.bf16.mxu0 %v719_v0  ;;  %599 = vmatpush3.bf16.msra.mxu1 %v598_v41 }
  0x4a   :  { %600 = vmatprep.subr.bf16.mxu1 %v719_v0 }
  0x4c   :  { %581 = vmatpush3.bf16.msra.mxu0 %v580_v23 }
  0x4d   :  { %582 = vmatprep.subr.bf16.mxu0 %v719_v0  ;;  %602 = vmatpush3.bf16.msra.mxu1 %v601_v44 }
  0x4e   :  { %603 = vmatprep.subr.bf16.mxu1 %v719_v0 }
  0x50   :  { %584 = vmatpush3.bf16.msra.mxu0 %v583_v26 }
  0x51   :  { %585 = vmatprep.subr.bf16.mxu0 %v719_v0  ;;  %605 = vmatpush3.bf16.msra.mxu1 %v604_v47 }
  0x52   :  { %606 = vmatprep.subr.bf16.mxu1 %v719_v0 }
  0x54   :  { %587 = vmatpush3.bf16.msra.mxu0 %v586_v29 }
  0x55   :  { %588 = vmatprep.subr.bf16.mxu0 %v719_v0  ;;  %608 = vmatpush3.bf16.msra.mxu1 %v607_v50 }
  0x56   :  { %609 = vmatprep.subr.bf16.mxu1 %v719_v0 }
  0x58   :  { %590 = vmatpush3.bf16.msra.mxu0 %v589_v32 }
  0x59   :  { %611 = vmatpush3.bf16.msra.mxu1 %v610_v53 }
  0x5a   :  { %612 = vmatprep.subr.bf16.mxu1 %v719_v0  ;;  %v613_v0 = vpack.c.bf16 %v340_v63, %v339_v62 }
  0x5d   :  { %614 = vmatpush3.bf16.msra.mxu1 %v613_v0 }
 0x10c   :  { %v144_v54 = vpop.f32.mrb[0].mxu0 }
 0x10d   :  { %v484_v55 = vpop.f32.mrb[1].mxu0 }
 0x112   :  { %v218_v56 = vpop.f32.mrb[0].mxu1 }
 0x113   :  { %v219_v58 = vadd.f32 %v218_v56, %v144_v54  ;;  %v493_v59 = vpop.f32.mrb[1].mxu1 }
 0x115   :  { %v229_v60 = vadd.f32 %v437_v57, %v219_v58 }
 0x117   :  { %v230_v61 = vmax.f32 %v229_v60, 0.0 }
 0x119   :  { %527 = vmatmul.mubr.f32.vlgmr.msra.gmra.mrb[2].mxu0 %v230_v61 }
 0x1ec   :  { %v320_v2 = vpop.f32.mrb[2].mxu0 }
 0x1ed   :  { %v321_v3 = vadd.f32 %v438_v1, %v320_v2  ;;  %v528_v4 = vpop.f32.mrb[3].mxu0 }
 0x1ef   :  { %v324_v5 = vmax.f32 %v321_v3, 0.0 }
 0x1f1   :  { %562 = vmatmul.mubr.f32.vlgmr.msra.gmra.mrb[2].mxu1 %v324_v5 }
 0x2c4   :  { %v414_v7 = vpop.f32.mrb[2].mxu1 }
 0x2c5   :  { %v415_v8 = vadd.f32 %v439_v6, %v414_v7  ;;  %v563_v9 = vpop.f32.mrb[3].mxu1 }
 0x2c7   :  { %418 = vst.msk [vmem:[#allocation8] sm:$0xff] %vm74_vm1, %v415_v8 }
 0x2c8   :  { %699 = shalt.err (!%p696_p0)
}
 0x2c9   :  { %s700_s23 = scalar_lea.hbm %s967_s9, 128 }
 0x2ca   :  { %p701_p1 = scmp.ne.s32.totalorder %s967_s9, %s700_s23  ;;  %p704_p2 = scmp.lt.u32.totalorder %s700_s23, %s967_s9 }
 0x2cc   :  { %p706_p3 = pnand %p704_p2, %p701_p1 }
 0x2ce   :  { %709 = shalt.err (!%p706_p3)
}
 0x2cf   :  { %428 = dma.vmem_to_hbm [thread:$0]  %s426_s12, 128, %s967_s9, [#allocation4]  }
 0x2d0   :  { %714 = dma.done.wait [#allocation4], 128  }
 0x2d1   :  { %715 = vsyncadd [#allocation4], 4294967168 }
 0x2d2   :  { %432 = vsyncpa [#allocation3], 1 }
 0x2d3   :  { %433 = vsyncpa [#allocation6], 1 }
 0x2d4   :  { %434 = vsyncpa [#allocation4], 1 }

// kernel: tpu_custom_call.1
= control target key start
LH: loop header
LB: loop body
LE: loop exit
PB: predicated region body
PF: predicated region fallthrough
CT: control target
= control target key end

     0   :  { %14 = vsyncpa [#allocation3], 0  ;;  %s958_s0 = inlined_call_operand.hbm [shape: f32[8,24], index: 0, kind: input, shape index: {}]   ;;  %s959_s1 = inlined_call_operand.hbm [shape: f32[8,8], index: 1, kind: input, shape index: {}]   ;;  %s960_s2 = inlined_call_operand.vmem [shape: f32[24,128], index: 2, kind: input, shape index: {}]   ;;  %s961_s3 = inlined_call_operand.hbm [shape: f32[8,128], index: 3, kind: input, shape index: {}]   ;;  %s962_s4 = inlined_call_operand.vmem [shape: f32[1,128], index: 4, kind: input, shape index: {}]   ;;  %s963_s5 = inlined_call_operand.vmem [shape: f32[128,128], index: 5, kind: input, shape index: {}]   ;;  %s964_s6 = inlined_call_operand.vmem [shape: f32[1,128], index: 6, kind: input, shape index: {}]   ;;  %s965_s7 = inlined_call_operand.vmem [shape: f32[128,8], index: 7, kind: input, shape index: {}]   ;;  %s966_s8 = inlined_call_operand.vmem [shape: f32[1,8], index: 8, kind: input, shape index: {}]   ;;  %s967_s9 = inlined_call_operand.hbm [shape: f32[8,8], index: 9, kind: output, shape index: {}]  }
   0x1   :  { %15 = vsyncpa [#allocation6], 0 }
   0x2   :  { %16 = vsyncpa [#allocation4], 0  ;;  %s716_s30 = smov [#allocation5]   ;;  %s717_s11 = smov [#allocation2]  }
   0x3   :  { %s33_s10 = sshll.u32 %s716_s30, 4  ;;  %s23_s12 = sshll.u32 %s717_s11, 4  ;;  %s34_s10 = int_to_ptr.vmem [resolvable:$true] %s33_s10  ;;  %s24_s12 = int_to_ptr.vmem [resolvable:$true] %s23_s12 }
   0x4   :  { %s622_s15 = scalar_lea.hbm %s959_s1, 128 }
   0x5   :  { %p623_p0 = scmp.ne.s32.totalorder %s959_s1, %s622_s15  ;;  %p626_p1 = scmp.lt.u32.totalorder %s622_s15, %s959_s1 }
   0x7   :  { %p628_p2 = pnand %p626_p1, %p623_p0 }
   0x9   :  { %631 = shalt.err (!%p628_p2)
}
   0xa   :  { %s632_s20 = scalar_lea.vmem %s34_s10, 128  ;;  %p637_p4 = scmp.lt.s32.totalorder %s34_s10, %s34_s10 }
   0xb   :  { %p633_p3 = scmp.ne.s32.totalorder %s34_s10, %s632_s20  ;;  %p638_p5 = scmp.lt.s32.totalorder %s632_s20, %s632_s20 }
   0xd   :  { %p639_p6 = por %p638_p5, %p637_p4 }
   0xf   :  { %p640_p7 = pnand %p639_p6, %p633_p3 }
  0x11   :  { %643 = shalt.err (!%p640_p7)
}
  0x12   :  { %36 = dma.hbm_to_vmem [thread:$0]  %s959_s1, 128, %s34_s10, [#allocation6]  }
  0x13   :  { %s644_s25 = scalar_lea.hbm %s958_s0, 128 }
  0x14   :  { %p645_p8 = scmp.ne.s32.totalorder %s958_s0, %s644_s25  ;;  %p648_p9 = scmp.lt.u32.totalorder %s644_s25, %s958_s0 }
  0x16   :  { %p650_p10 = pnand %p648_p9, %p645_p8 }
  0x18   :  { %653 = shalt.err (!%p650_p10)
}
  0x19   :  { %s654_s30 = scalar_lea.vmem %s24_s12, 128  ;;  %p659_p12 = scmp.lt.s32.totalorder %s24_s12, %s24_s12 }
  0x1a   :  { %p655_p11 = scmp.ne.s32.totalorder %s24_s12, %s654_s30  ;;  %p660_p13 = scmp.lt.s32.totalorder %s654_s30, %s654_s30 }
  0x1c   :  { %p661_p0 = por %p660_p13, %p659_p12 }
  0x1e   :  { %p662_p1 = pnand %p661_p0, %p655_p11 }
  0x20   :  { %665 = shalt.err (!%p662_p1)
}
  0x21   :  { %26 = dma.hbm_to_vmem [thread:$0]  %s958_s0, 128, %s24_s12, [#allocation3]  }
  0x22   :  { %s718_s11 = smov [#allocation7]   ;;  %s666_s16 = scalar_lea.hbm %s961_s3, 128 }
  0x23   :  { %s45_s13 = sshll.u32 %s718_s11, 4  ;;  %p667_p2 = scmp.ne.s32.totalorder %s961_s3, %s666_s16  ;;  %s46_s13 = int_to_ptr.vmem [resolvable:$true] %s45_s13 }
  0x24   :  { %p670_p3 = scmp.lt.u32.totalorder %s666_s16, %s961_s3 }
  0x26   :  { %p672_p4 = pnand %p670_p3, %p667_p2 }
  0x28   :  { %675 = shalt.err (!%p672_p4)
}
  0x29   :  { %s676_s21 = scalar_lea.vmem %s46_s13, 128  ;;  %p681_p6 = scmp.lt.s32.totalorder %s46_s13, %s46_s13 }
  0x2a   :  { %p677_p5 = scmp.ne.s32.totalorder %s46_s13, %s676_s21  ;;  %p682_p7 = scmp.lt.s32.totalorder %s676_s21, %s676_s21 }
  0x2c   :  { %p683_p8 = por %p682_p7, %p681_p6 }
  0x2e   :  { %p684_p9 = pnand %p683_p8, %p677_p5 }
  0x30   :  { %687 = shalt.err (!%p684_p9)
}
  0x31   :  { %48 = dma.hbm_to_vmem [thread:$0]  %s961_s3, 128, %s46_s13, [#allocation6]  }
  0x32   :  { %710 = dma.done.wait [#allocation3], 128  }
  0x33   :  { %711 = vsyncadd [#allocation3], 4294967168 }
  0x34   :  { %712 = dma.done.wait [#allocation6], 256  }
  0x35   :  { %713 = vsyncadd [#allocation6], 4294967040  ;;  %v719_v0 = vmov 0.0|0.0   ;;  %v720_v1 = vmov 0.0   ;;  %vm721_vm0 = vmmov 0   ;;  %vm74_vm1 = vcmask 64512  }
  0x36   :  { %564 = vmatprep.subr.bf16.mxu1 %v719_v0  ;;  %480 = vmatprep.subr.mxu0 %v720_v1  ;;  %v69_v2 = vld [vmem:[%s960_s2] sm:$0xff]  ;;  %v70_v3 = vld [vmem:[%s960_s2 + $0x8] sm:$0xff]  ;;  %v73_v4 = vld [vmem:[#allocation7] sm:$0xff]  ;;  %vm148_vm2 = vcmask 195584   ;;  %s722_s0 = smov [#allocation8]  }
  0x37   :  { %482 = vmatprep.mubr.msk.f32.mxu0 %vm721_vm0, %v720_v1  ;;  %491 = vmatprep.mubr.msk.f32.mxu1 %vm721_vm0, %v720_v1  ;;  %v565_v5 = vpack.c.bf16 %v70_v3, %v69_v2  ;;  %v72_v6 = vld [vmem:[#allocation5] sm:$0xff]  ;;  %v231_v7 = vld [vmem:[%s963_s5] sm:$0xff]  ;;  %v233_v9 = vld [vmem:[%s963_s5 + $0x10] sm:$0xff]  ;;  %s425_s12 = sshll.u32 %s722_s0, 4  ;;  %s426_s12 = int_to_ptr.vmem [resolvable:$true] %s425_s12 }
  0x38   :  { %481 = vmatpush3.msra.mxu0 %v73_v4  ;;  %v232_v8 = vld [vmem:[%s963_s5 + $0x8] sm:$0xff]  ;;  %v234_v11 = vld [vmem:[%s963_s5 + $0x18] sm:$0xff]  ;;  %v71_v12 = vld [vmem:[%s960_s2 + $0x10] sm:$0xff]  ;;  %p693_p11 = scmp.lt.s32.totalorder %s426_s12, %s426_s12 }
  0x39   :  { %483 = vmatmul.mubr.msk.f32.vlgmr.msra.gmra.mrb[0].mxu0 %vm74_vm1, %v72_v6  ;;  %567 = vmatprep.subr.bf16.mxu0 %v719_v0  ;;  %v568_v10 = vpack.c.bf16 %v232_v8, %v231_v7  ;;  %v68_v13 = vld [vmem:[#allocation2] sm:$0xff]  ;;  %v571_v14 = vpack.c.bf16 %v234_v11, %v233_v9  ;;  %v236_v16 = vld [vmem:[%s963_s5 + $0x28] sm:$0xff]  ;;  %v237_v18 = vld [vmem:[%s963_s5 + $0x30] sm:$0xff] }
  0x3a   :  { %566 = vmatpush3.bf16.msra.mxu1 %v565_v5  ;;  %526 = vmatprep.mubr.msk.f32.mxu0 %vm721_vm0, %v720_v1  ;;  %v235_v15 = vld [vmem:[%s963_s5 + $0x20] sm:$0xff]  ;;  %v238_v19 = vld [vmem:[%s963_s5 + $0x38] sm:$0xff]  ;;  %v240_v22 = vld [vmem:[%s963_s5 + $0x48] sm:$0xff] }
  0x3b   :  { %489 = vmatprep.subr.mxu1 %v720_v1  ;;  %569 = vmatpush3.bf16.msra.mxu0 %v568_v10  ;;  %v574_v17 = vpack.c.bf16 %v236_v16, %v235_v15  ;;  %v577_v20 = vpack.c.bf16 %v238_v19, %v237_v18  ;;  %v239_v21 = vld [vmem:[%s963_s5 + $0x40] sm:$0xff]  ;;  %v241_v24 = vld [vmem:[%s963_s5 + $0x50] sm:$0xff]  ;;  %v242_v25 = vld [vmem:[%s963_s5 + $0x58] sm:$0xff] }
  0x3c   :  { %570 = vmatprep.subr.bf16.mxu0 %v719_v0  ;;  %v580_v23 = vpack.c.bf16 %v240_v22, %v239_v21  ;;  %v583_v26 = vpack.c.bf16 %v242_v25, %v241_v24  ;;  %v243_v27 = vld [vmem:[%s963_s5 + $0x60] sm:$0xff]  ;;  %v244_v28 = vld [vmem:[%s963_s5 + $0x68] sm:$0xff]  ;;  %v245_v30 = vld [vmem:[%s963_s5 + $0x70] sm:$0xff] }
  0x3d   :  { %v586_v29 = vpack.c.bf16 %v244_v28, %v243_v27  ;;  %v246_v31 = vld [vmem:[%s963_s5 + $0x78] sm:$0xff]  ;;  %v325_v33 = vld [vmem:[%s965_s7] sm:$0xff]  ;;  %v326_v34 = vld [vmem:[%s965_s7 + $0x8] sm:$0xff] }
  0x3e   :  { %490 = vmatpush3.msra.mxu1 %v71_v12  ;;  %v589_v32 = vpack.c.bf16 %v246_v31, %v245_v30  ;;  %v327_v35 = vld [vmem:[%s965_s7 + $0x10] sm:$0xff]  ;;  %v592_v36 = vpack.c.bf16 %v326_v34, %v325_v33  ;;  %v328_v37 = vld [vmem:[%s965_s7 + $0x18] sm:$0xff]  ;;  %v329_v39 = vld [vmem:[%s965_s7 + $0x20] sm:$0xff] }
  0x3f   :  { %492 = vmatmul.mubr.msk.f32.vlgmr.msra.gmra.mrb[0].mxu1 %vm148_vm2, %v68_v13  ;;  %591 = vmatprep.subr.bf16.mxu1 %v719_v0  ;;  %v595_v38 = vpack.c.bf16 %v328_v37, %v327_v35  ;;  %v330_v40 = vld [vmem:[%s965_s7 + $0x28] sm:$0xff]  ;;  %v331_v42 = vld [vmem:[%s965_s7 + $0x30] sm:$0xff]  ;;  %v332_v43 = vld [vmem:[%s965_s7 + $0x38] sm:$0xff] }
  0x40   :  { %572 = vmatpush3.bf16.msra.mxu0 %v571_v14  ;;  %561 = vmatprep.mubr.msk.f32.mxu1 %vm721_vm0, %v720_v1  ;;  %v598_v41 = vpack.c.bf16 %v330_v40, %v329_v39  ;;  %v601_v44 = vpack.c.bf16 %v332_v43, %v331_v42  ;;  %v333_v45 = vld [vmem:[%s965_s7 + $0x40] sm:$0xff]  ;;  %v334_v46 = vld [vmem:[%s965_s7 + $0x48] sm:$0xff]  ;;  %v335_v48 = vld [vmem:[%s965_s7 + $0x50] sm:$0xff] }
  0x41   :  { %573 = vmatprep.subr.bf16.mxu0 %v719_v0  ;;  %593 = vmatpush3.bf16.msra.mxu1 %v592_v36  ;;  %v604_v47 = vpack.c.bf16 %v334_v46, %v333_v45  ;;  %v336_v49 = vld [vmem:[%s965_s7 + $0x58] sm:$0xff]  ;;  %v337_v51 = vld [vmem:[%s965_s7 + $0x60] sm:$0xff]  ;;  %v338_v52 = vld [vmem:[%s965_s7 + $0x68] sm:$0xff] }
  0x42   :  { %594 = vmatprep.subr.bf16.mxu1 %v719_v0  ;;  %v607_v50 = vpack.c.bf16 %v336_v49, %v335_v48  ;;  %v610_v53 = vpack.c.bf16 %v338_v52, %v337_v51  ;;  %v437_v57 = vld [vmem:[%s962_s4] ss:$0 sm:$0xff]  ;;  %v339_v62 = vld [vmem:[%s965_s7 + $0x70] sm:$0xff]  ;;  %v340_v63 = vld [vmem:[%s965_s7 + $0x78] sm:$0xff]  ;;  %s688_s7 = scalar_lea.vmem %s426_s12, 128 }
  0x43   :  { %v438_v1 = vld [vmem:[%s964_s6] ss:$0 sm:$0xff]  ;;  %p689_p10 = scmp.ne.s32.totalorder %s426_s12, %s688_s7  ;;  %p694_p12 = scmp.lt.s32.totalorder %s688_s7, %s688_s7 }
  0x44   :  { %575 = vmatpush3.bf16.msra.mxu0 %v574_v17  ;;  %v439_v6 = vld [vmem:[%s966_s8] ss:$0 sm:$0xff] }
  0x45   :  { %576 = vmatprep.subr.bf16.mxu0 %v719_v0  ;;  %596 = vmatpush3.bf16.msra.mxu1 %v595_v38  ;;  %p695_p13 = por %p694_p12, %p693_p11 }
  0x46   :  { %597 = vmatprep.subr.bf16.mxu1 %v719_v0 }
  0x47   :  { %p696_p0 = pnand %p695_p13, %p689_p10 }
  0x48   :  { %578 = vmatpush3.bf16.msra.mxu0 %v577_v20 }
  0x49   :  { %579 = vmatprep.subr.bf16.mxu0 %v719_v0  ;;  %599 = vmatpush3.bf16.msra.mxu1 %v598_v41 }
  0x4a   :  { %600 = vmatprep.subr.bf16.mxu1 %v719_v0 }
  0x4c   :  { %581 = vmatpush3.bf16.msra.mxu0 %v580_v23 }
  0x4d   :  { %582 = vmatprep.subr.bf16.mxu0 %v719_v0  ;;  %602 = vmatpush3.bf16.msra.mxu1 %v601_v44 }
  0x4e   :  { %603 = vmatprep.subr.bf16.mxu1 %v719_v0 }
  0x50   :  { %584 = vmatpush3.bf16.msra.mxu0 %v583_v26 }
  0x51   :  { %585 = vmatprep.subr.bf16.mxu0 %v719_v0  ;;  %605 = vmatpush3.bf16.msra.mxu1 %v604_v47 }
  0x52   :  { %606 = vmatprep.subr.bf16.mxu1 %v719_v0 }
  0x54   :  { %587 = vmatpush3.bf16.msra.mxu0 %v586_v29 }
  0x55   :  { %588 = vmatprep.subr.bf16.mxu0 %v719_v0  ;;  %608 = vmatpush3.bf16.msra.mxu1 %v607_v50 }
  0x56   :  { %609 = vmatprep.subr.bf16.mxu1 %v719_v0 }
  0x58   :  { %590 = vmatpush3.bf16.msra.mxu0 %v589_v32 }
  0x59   :  { %611 = vmatpush3.bf16.msra.mxu1 %v610_v53 }
  0x5a   :  { %612 = vmatprep.subr.bf16.mxu1 %v719_v0  ;;  %v613_v0 = vpack.c.bf16 %v340_v63, %v339_v62 }
  0x5d   :  { %614 = vmatpush3.bf16.msra.mxu1 %v613_v0 }
 0x10c   :  { %v144_v54 = vpop.f32.mrb[0].mxu0 }
 0x10d   :  { %v484_v55 = vpop.f32.mrb[1].mxu0 }
 0x112   :  { %v218_v56 = vpop.f32.mrb[0].mxu1 }
 0x113   :  { %v219_v58 = vadd.f32 %v218_v56, %v144_v54  ;;  %v493_v59 = vpop.f32.mrb[1].mxu1 }
 0x115   :  { %v229_v60 = vadd.f32 %v437_v57, %v219_v58 }
 0x117   :  { %v230_v61 = vmax.f32 %v229_v60, 0.0 }
 0x119   :  { %527 = vmatmul.mubr.f32.vlgmr.msra.gmra.mrb[2].mxu0 %v230_v61 }
 0x1ec   :  { %v320_v2 = vpop.f32.mrb[2].mxu0 }
 0x1ed   :  { %v321_v3 = vadd.f32 %v438_v1, %v320_v2  ;;  %v528_v4 = vpop.f32.mrb[3].mxu0 }
 0x1ef   :  { %v324_v5 = vmax.f32 %v321_v3, 0.0 }
 0x1f1   :  { %562 = vmatmul.mubr.f32.vlgmr.msra.gmra.mrb[2].mxu1 %v324_v5 }
 0x2c4   :  { %v414_v7 = vpop.f32.mrb[2].mxu1 }
 0x2c5   :  { %v415_v8 = vadd.f32 %v439_v6, %v414_v7  ;;  %v563_v9 = vpop.f32.mrb[3].mxu1 }
 0x2c7   :  { %418 = vst.msk [vmem:[#allocation8] sm:$0xff] %vm74_vm1, %v415_v8 }
 0x2c8   :  { %699 = shalt.err (!%p696_p0)
}
 0x2c9   :  { %s700_s23 = scalar_lea.hbm %s967_s9, 128 }
 0x2ca   :  { %p701_p1 = scmp.ne.s32.totalorder %s967_s9, %s700_s23  ;;  %p704_p2 = scmp.lt.u32.totalorder %s700_s23, %s967_s9 }
 0x2cc   :  { %p706_p3 = pnand %p704_p2, %p701_p1 }
 0x2ce   :  { %709 = shalt.err (!%p706_p3)
}
 0x2cf   :  { %428 = dma.vmem_to_hbm [thread:$0]  %s426_s12, 128, %s967_s9, [#allocation4]  }
 0x2d0   :  { %714 = dma.done.wait [#allocation4], 128  }
 0x2d1   :  { %715 = vsyncadd [#allocation4], 4294967168 }
 0x2d2   :  { %432 = vsyncpa [#allocation3], 1 }
 0x2d3   :  { %433 = vsyncpa [#allocation6], 1 }
 0x2d4   :  { %434 = vsyncpa [#allocation4], 1 }

</bundles_post_ra>
